<compile_context>
chip_gen: v6e
topology: v6e:2x2x1
jax: 0.10.0
libtpu: 0.0.40
codegen_flags: <defaults>
</compile_context>

<pallas_src>
import math

import jax
import jax.numpy as jnp
from jax.experimental import pallas as pl
from jax.experimental.pallas import tpu as pltpu


# ----------------------------------------------------------------------------
# Buffer construction (mirrors nn.Module.__init__, built exactly once)
# ----------------------------------------------------------------------------
def make_positional_encoding(d_model: int, max_len: int = 50) -> jnp.ndarray:
    """Sinusoidal PE table, shape (max_len, d_model), float32."""
    assert d_model % 2 == 0, "d_model must be even (same limitation as the PyTorch reference)"
    position = jnp.arange(max_len, dtype=jnp.float32)[:, None]            # (L, 1)
    div_term = jnp.exp(
        jnp.arange(0, d_model, 2, dtype=jnp.float32) * (-math.log(10000.0) / d_model)
    )                                                                      # (D/2,)
    pe = jnp.zeros((max_len, d_model), dtype=jnp.float32)
    pe = pe.at[:, 0::2].set(jnp.sin(position * div_term))
    pe = pe.at[:, 1::2].set(jnp.cos(position * div_term))
    return pe                                                              # (L, D)


def make_slot_pe_table(d_model: int, num_slots: int, max_len: int = 50) -> jnp.ndarray:
    """Slot-replicated, lane-padded PE table: shape (max_len, ND_pad), float32.

    Analogue of the PyTorch module's `self.pe` buffer: build once at module
    construction, reuse for every forward (avoids per-call HBM traffic for the
    tiled table).  Layout matches x.reshape(B, S, N*D); the last columns are
    zero-padding so ND_pad is a multiple of 128 (full-lane stores).
    """
    pe = make_positional_encoding(d_model, max_len)                        # (L, D)
    table = jnp.tile(pe, (1, num_slots))                                   # (L, N*D)
    nd = num_slots * d_model
    nd_pad = pl.cdiv(nd, 128) * 128
    if nd_pad != nd:
        table = jnp.pad(table, ((0, 0), (0, nd_pad - nd)))
    return table                                                           # (L, ND_pad)


# ----------------------------------------------------------------------------
# Pallas kernel: out[b, s, :] = x[b, s, :] + pe_table[s, :]
# ----------------------------------------------------------------------------
def _pe_add_kernel(x_ref, pe_ref, o_ref):
    # x_ref: (TB, TS, ND_pad); pe_ref: (TS, ND_pad) broadcast over the batch tile.
    # Add in float32 (the torch buffer is f32 and promotes half/bf16 inputs).
    acc = x_ref[...].astype(jnp.float32) + pe_ref[...].astype(jnp.float32)[None, :, :]
    o_ref[...] = acc.astype(o_ref.dtype)


# ----------------------------------------------------------------------------
# Tiling helpers
# ----------------------------------------------------------------------------
def _largest_divisor_at_most(n: int, cap: int, multiple: int = 1):
    """Largest d <= cap with n % d == 0 and d % multiple == 0, else None."""
    for d in range(min(n, cap), 0, -1):
        if n % d == 0 and d % multiple == 0:
            return d
    return None


def _default_target_tile_bytes() -> int:
    """Per-generation budget for (x-in + out) bytes per grid step."""
    try:
        kind = jax.devices()[0].device_kind.lower()
    except Exception:
        kind = ""
    if "v5 lite" in kind or "v5e" in kind or "v5lite" in kind:
        return 2 << 20   # keep double-buffered in+out under v5e's 16 MiB scoped default
    if "v6" in kind:
        return 4 << 20   # ~86-90% of 1.4 TB/s roofline; far under 32 MiB scoped default
    if "7" in kind:
        return 8 << 20   # v7x: amortize 0.35us/step at 3.2 TB/s; still < 32 MiB scoped
    return 4 << 20


# ----------------------------------------------------------------------------
# Forward
# ----------------------------------------------------------------------------
def slot_positional_encoding(x, pe_table, *, target_tile_bytes=None, donate_input=False):
    """
    x        : (B, Seq, Num_Slots, D)
    pe_table : (max_len, ND_pad) buffer from make_slot_pe_table (float32)
    Returns x + pe broadcast over batch and slots (eval-mode forward).
    """
    B, S, N, D = x.shape
    ND = N * D
    L, ND_pad = pe_table.shape
    assert S <= L, "sequence length exceeds max_len of the PE table"
    assert ND_pad == pl.cdiv(ND, 128) * 128, (
        "pe_table does not match x's (num_slots, d_model); build it with make_slot_pe_table")

    # TODO(synk): nn.Dropout is identity in eval mode; training-mode dropout is
    # omitted (it cannot bit-match torch's RNG stream anyway).

    out_dtype = jnp.result_type(x.dtype, pe_table.dtype)   # torch promotion: bf16 + f32 -> f32
    x_item = jnp.dtype(x.dtype).itemsize
    o_item = jnp.dtype(out_dtype).itemsize

    # Lane-dense layout: fold slots into the feature axis; pad to a 128 multiple
    # (rare) so every store is a full, unmasked vst.
    x2 = x.reshape(B, S, ND)
    if ND_pad != ND:
        x2 = jnp.pad(x2, ((0, 0), (0, 0), (0, ND_pad - ND)))

    # ---- tile selection ------------------------------------------------------
    if target_tile_bytes is None:
        target_tile_bytes = _default_target_tile_bytes()
    row_bytes = ND_pad * (x_item + o_item)                  # in+out bytes per (batch,seq) row
    sub_map = {1: 32, 2: 16, 4: 8, 8: 8}
    sub = max(sub_map.get(x_item, 8), sub_map.get(o_item, 8))   # dtype sublane multiple

    ts_cap = max(1, target_tile_bytes // row_bytes)
    pe_arg = pe_table

    # seq tile: legal (multiple of 8, or full extent of BOTH x and the table),
    # preferring even divisors of S at the dtype's sublane multiple.
    if S <= ts_cap and (S % 8 == 0 or S == L):
        ts = S
    elif S < 8:
        pe_arg = pe_table[:S]          # tiny slice -> ts == full extent for both operands
        ts = S
    else:
        cap = min(ts_cap, S)
        ts = (_largest_divisor_at_most(S, cap, multiple=sub)
              or _largest_divisor_at_most(S, cap, multiple=8)
              or max(8, min((S // 8) * 8, (cap // 8) * 8)))

    # batch tile: even divisor of B within the remaining budget.
    tb_cap = max(1, target_tile_bytes // (ts * row_bytes))
    tb = _largest_divisor_at_most(B, min(B, tb_cap)) or 1

    # Never collapse to a single grid step: v7x's two TensorCores only help if
    # the "parallel" axes have >= 2 steps to shard.
    if pl.cdiv(S, ts) * pl.cdiv(B, tb) < 2:
        if B >= 2:
            tb = _largest_divisor_at_most(B, B // 2) or max(1, B // 2)
        elif S >= 2 * sub:
            ts = _largest_divisor_at_most(S, S // 2, multiple=sub) or ((S // 2) // sub) * sub

    # seq outer, batch inner: the PE block index only depends on the seq tile,
    # so the (small) PE block is not re-fetched per batch step.
    grid = (pl.cdiv(S, ts), pl.cdiv(B, tb))

    cost = pl.CostEstimate(
        flops=B * S * ND_pad,
        transcendentals=0,
        bytes_accessed=(x2.size * x_item + B * S * ND_pad * o_item
                        + S * ND_pad * jnp.dtype(pe_table.dtype).itemsize),
    )

    io_aliases = {}
    if donate_input and x2.dtype == out_dtype:
        io_aliases = {0: 0}            # reuse x2's HBM buffer for the output

    out = pl.pallas_call(
        _pe_add_kernel,
        out_shape=jax.ShapeDtypeStruct((B, S, ND_pad), out_dtype),
        grid_spec=pltpu.PrefetchScalarGridSpec(
            num_scalar_prefetch=0,
            grid=grid,
            in_specs=[
                pl.BlockSpec((tb, ts, ND_pad), lambda si, bi: (bi, si, 0)),
                pl.BlockSpec((ts, ND_pad), lambda si, bi: (si, 0)),
            ],
            out_specs=pl.BlockSpec((tb, ts, ND_pad), lambda si, bi: (bi, si, 0)),
        ),
        compiler_params=pltpu.CompilerParams(
            dimension_semantics=("parallel", "parallel"),
        ),
        cost_estimate=cost,
        input_output_aliases=io_aliases,
    )(x2, pe_arg)

    if ND_pad != ND:
        out = out[..., :ND]
    return out.reshape(B, S, N, D)


# ----------------------------------------------------------------------------
# Demo / self-check
# ----------------------------------------------------------------------------
if __name__ == "__main__":
    key = jax.random.PRNGKey(0)
    fwd = jax.jit(slot_positional_encoding)

    # (B, S, N, D, max_len): lane-aligned ND, lane-padded ND (72 -> 128), and a
    # larger case exercising the even-divisor / >=2-step tiling.
    cases = [
        (2, 8, 4, 32, 50),
        (4, 16, 3, 24, 50),
        (8, 40, 8, 128, 50),
    ]
    for i, (B, S, N, D, max_len) in enumerate(cases):
        k = jax.random.fold_in(key, i)
        x = jax.random.normal(k, (B, S, N, D), dtype=jnp.float32)

        pe = make_positional_encoding(D, max_len=max_len)            # reference table
        pe_table = make_slot_pe_table(D, N, max_len=max_len)          # module buffer (built once)

        y = jax.block_until_ready(fwd(x, pe_table))
        r = x.astype(jnp.float32) + pe[:S][None, :, None, :]

        assert y.shape == x.shape, f"shape mismatch in case {i}"
        assert jnp.allclose(y, r, atol=1e-6, rtol=1e-6), f"mismatch vs reference in case {i}"

    print("KERNEL_OK")
</pallas_src>

<mosaic_0001>
module attributes {stable_mosaic.version = 11 : i64} {
  func.func @_pe_add_kernel(%arg0: i32, %arg1: i32, %arg2: memref<1x8x128xf32, #tpu.memory_space<vmem>>, %arg3: memref<8x128xf32, #tpu.memory_space<vmem>>, %arg4: memref<1x8x128xf32, #tpu.memory_space<vmem>>) attributes {dimension_semantics = [#tpu.dimension_semantics<parallel>, #tpu.dimension_semantics<parallel>], iteration_bounds = array<i64: 1, 2>, scalar_prefetch = 0 : i64, scratch_operands = 0 : i64, tpu.core_type = #tpu.core_type<tc>, window_params = [{transform_indices = @transform_0, window_bounds = array<i64: 1, 8, 128>}, {transform_indices = @transform_1, window_bounds = array<i64: 8, 128>}, {transform_indices = @transform_2, window_bounds = array<i64: 1, 8, 128>}]} {
    %c0 = arith.constant 0 : index
    %c0_0 = arith.constant 0 : index
    %c0_1 = arith.constant 0 : index
    %0 = vector.load %arg2[%c0, %c0_0, %c0_1] : memref<1x8x128xf32, #tpu.memory_space<vmem>>, vector<1x8x128xf32>
    %c0_2 = arith.constant 0 : index
    %c0_3 = arith.constant 0 : index
    %1 = vector.load %arg3[%c0_2, %c0_3] : memref<8x128xf32, #tpu.memory_space<vmem>>, vector<8x128xf32>
    %2 = vector.shape_cast %1 : vector<8x128xf32> to vector<1x8x128xf32>
    %3 = arith.addf %0, %2 : vector<1x8x128xf32>
    %c0_4 = arith.constant 0 : index
    %c0_5 = arith.constant 0 : index
    %c0_6 = arith.constant 0 : index
    %4 = vector.load %arg4[%c0_4, %c0_5, %c0_6] : memref<1x8x128xf32, #tpu.memory_space<vmem>>, vector<1x8x128xf32>
    tpu.vector_store %arg4[%c0_4, %c0_5, %c0_6], %3 {strides = array<i32>} : memref<1x8x128xf32, #tpu.memory_space<vmem>>, vector<1x8x128xf32>,
    return
  }
  func.func @transform_0(%arg0: i32, %arg1: i32) -> (i32, i32, i32) {
    %c0_i32 = arith.constant 0 : i32
    %c0_i32_0 = arith.constant 0 : i32
    return %arg1, %arg0, %c0_i32 : i32, i32, i32
  }
  func.func @transform_1(%arg0: i32, %arg1: i32) -> (i32, i32) {
    %c0_i32 = arith.constant 0 : i32
    %c0_i32_0 = arith.constant 0 : i32
    return %arg0, %c0_i32 : i32, i32
  }
  func.func @transform_2(%arg0: i32, %arg1: i32) -> (i32, i32, i32) {
    %c0_i32 = arith.constant 0 : i32
    %c0_i32_0 = arith.constant 0 : i32
    return %arg1, %arg0, %c0_i32 : i32, i32, i32
  }
}

</mosaic_0001>

<bundles_post_ra>
// kernel: slot_positional_encoding.1
= control target key start
LH: loop header
LB: loop body
LE: loop exit
PB: predicated region body
PF: predicated region fallthrough
CT: control target
= control target key end

     0   :  { %s354_s9 = smov 0   ;;  %s331_s10 = smov 0   ;;  %s368_s0 = inlined_call_operand.vmem [shape: f32[2,8,128], index: 0, kind: input, shape index: {}]   ;;  %s369_s1 = inlined_call_operand.vmem [shape: f32[50,128], index: 1, kind: input, shape index: {}]   ;;  %s370_s2 = inlined_call_operand.vmem [shape: f32[2,8,128], index: 2, kind: output, shape index: {}]  }
   0x1   :  { %s335_s11 = smov 0  }
   0x2 LB: > { %s21_s12 = sadd.s32 1, %s333_s10  ;;  %p286_p0 = scmp.ge.s32.totalorder %s337_s11, 1  ;;  %s337_s11 = sphi %s335_s11, %s12_s11   ;;  %s333_s10 = sphi %s331_s10, %s332_s10   ;;  %s329_s9 = sphi %s354_s9, %s371_s9  }
   0x3   : > { %p22_p1 = scmp.ge.s32.totalorder %s21_s12, 2  ;;  %p139_p2 = scmp.lt.s32.totalorder %s337_s11, 3 }
   0x5   : > { %s373_s12 = smov (%p22_p1, %s21_s12), 0  ;;  %p140_p3 = pnand %p286_p0, %p139_p2 }
   0x6   : > { %p169_p4 = scmp.lt.s32.totalorder (!%p140_p3), %s329_s9, 1 }
   0x7   : > { %143 = sbr.rel (%p140_p3) target bundleno = 19 (0x13), region = 28 }
   0xc   : > { %s375_s9 = smov (!%p169_p4, %s329_s9), 1  ;;  %v188_v0 = vld [vmem:[%s369_s1] sm:$0xff] }
   0xd   : > { %s287_s13 = sshll.u32 %s375_s9, 3 }
   0xe   : > { %s175_s18 = scalar_lea.vmem %s368_s0, %s287_s13  ;;  %s186_s21 = scalar_lea.vmem %s370_s2, %s287_s13 }
   0xf   : > { %v187_v1 = vld [vmem:[%s175_s18] sm:$0xff] }
  0x10   : > { %v189_v2 = vadd.f32 %v188_v0, %v187_v1 }
  0x12   : > { %190 = vst [vmem:[%s186_s21] sm:$0xff] %v189_v2 }
  0x13 PF: > { %s12_s11 = sadd.s32 1, %s337_s11   ;;  %s371_s9 = smov %s333_s10 }
  0x14   : > { %p9_p5 = scmp.ge.s32.totalorder %s12_s11, 4   ;;  %s332_s10 = smov %s373_s12  }
  0x16   :  { %11 = sbr.rel (!%p9_p5) target bundleno = 2 (0x2), region = 61 }

</bundles_post_ra>
